<compile_context>
chip_gen: v6e
topology: v6e:2x2x1
jax: 0.10.0
libtpu: 0.0.40
codegen_flags: <defaults>
</compile_context>

<pallas_src>
import functools

import jax
import jax.numpy as jnp
from jax.experimental import pallas as pl
from jax.experimental.pallas import tpu as pltpu

_LANE = 128


def _round_up(x, m):
    return ((x + m - 1) // m) * m


def _min_rows(dtype):
    """Minimum batch-tile rows from sublane packing: f32->8, bf16->16, int8/fp8->32."""
    return max(8, 32 // jnp.dtype(dtype).itemsize)


def _vmem_capacity_bytes():
    """Per-TensorCore VMEM capacity; conservative 64 MiB (v7x) if the query fails."""
    try:
        return int(pltpu.get_tpu_info().vmem_capacity_bytes)
    except Exception:  # capability query only -- never masks kernel errors
        return 64 * 1024 * 1024


@functools.lru_cache(maxsize=None)
def _single_buffer_supported():
    """One-time probe: does this JAX/Mosaic accept pipeline_mode=pl.Buffered(1)?"""
    if not hasattr(pl, "Buffered"):
        return False

    def k(a_ref, b_ref, o_ref):
        o_ref[...] = a_ref[...] + b_ref[...]

    try:
        x = jnp.ones((8, _LANE), jnp.float32)
        out = pl.pallas_call(
            k,
            out_shape=jax.ShapeDtypeStruct((8, _LANE), jnp.float32),
            grid=(1,),
            in_specs=[
                pl.BlockSpec((8, _LANE), lambda i: (0, 0)),
                pl.BlockSpec((8, _LANE), lambda i: (0, 0),
                             pipeline_mode=pl.Buffered(1)),
            ],
            out_specs=pl.BlockSpec((8, _LANE), lambda i: (0, 0)),
        )(x, x)
        jax.block_until_ready(out)
        return True
    except Exception:  # one-time capability probe, cached; real build never re-tries
        return False


def _pick_tile(dim, cap):
    """Largest multiple of 128 that divides `dim` and is <= cap (dim is 128-multiple)."""
    t = max(_LANE, min(cap, dim) - (min(cap, dim) % _LANE))
    while dim % t:
        t -= _LANE
    return t


# --------------------------- kernels ---------------------------------------------------

def _fused_mlp_kernel(n_layers, x_ref, *rest):
    """Fused MLP: all layers computed on one batch tile with weights resident in VMEM."""
    *w_refs, b_ref, o_ref = rest
    assert len(w_refs) == n_layers
    h = x_ref[...]                                     # MXU input in compute dtype
    for i in range(n_layers):
        w = w_refs[i][...]                             # [in_pad_i, out_pad_i]
        do = w.shape[1]
        b = b_ref[i:i + 1, :do].astype(jnp.float32)    # [1, out_pad_i]
        acc = jnp.dot(h, w, preferred_element_type=jnp.float32) + b
        acc = jnp.maximum(acc, 0.0)                    # ReLU (f32 epilogue)
        h = acc.astype(x_ref.dtype)                    # next layer's MXU input
        # dropout (eval/inference mode) == identity
    o_ref[...] = h.astype(o_ref.dtype)


def _linear_relu_kernel(x_ref, w_ref, b_ref, o_ref, acc_ref):
    """One layer, M/N/K tiled: relu(x @ w + b) with f32 accumulator scratch."""
    @pl.when(pl.program_id(2) == 0)
    def _():
        acc_ref[...] = jnp.zeros_like(acc_ref)

    acc_ref[...] += jnp.dot(x_ref[...], w_ref[...],
                            preferred_element_type=jnp.float32)

    @pl.when(pl.program_id(2) == pl.num_programs(2) - 1)
    def _():
        o_ref[...] = jnp.maximum(
            acc_ref[...] + b_ref[...].astype(jnp.float32), 0.0
        ).astype(o_ref.dtype)


def _linear_relu_tiled(h, w_p, b_p, *, tile_m, tile_n, tile_k, vmem_budget):
    M, K = h.shape
    _, N = w_p.shape
    grid = (M // tile_m, N // tile_n, K // tile_k)
    itemsize = jnp.dtype(h.dtype).itemsize
    need = 2 * (tile_m * tile_k + tile_k * tile_n + tile_m * tile_n + tile_n) * itemsize
    need += tile_m * tile_n * 4                       # f32 accumulator scratch
    vmem_limit = min(vmem_budget, max(int(1.25 * need), 4 << 20))
    return pl.pallas_call(
        _linear_relu_kernel,
        out_shape=jax.ShapeDtypeStruct((M, N), h.dtype),
        grid_spec=pltpu.PrefetchScalarGridSpec(
            num_scalar_prefetch=0,
            grid=grid,
            in_specs=[
                pl.BlockSpec((tile_m, tile_k), lambda i, j, k: (i, k)),
                pl.BlockSpec((tile_k, tile_n), lambda i, j, k: (k, j)),
                pl.BlockSpec((1, tile_n), lambda i, j, k: (0, j)),
            ],
            out_specs=pl.BlockSpec((tile_m, tile_n), lambda i, j, k: (i, j)),
            scratch_shapes=[pltpu.VMEM((tile_m, tile_n), jnp.float32)],
        ),
        compiler_params=pltpu.CompilerParams(
            dimension_semantics=("parallel", "parallel", "arbitrary"),
            vmem_limit_bytes=vmem_limit,
        ),
    )(h, w_p, b_p)


# --------------------------- model builder ---------------------------------------------

def make_forecasting_model(weights, biases, *, compute_dtype=None, tile_m=None,
                           force_tiled=False):
    """Pad parameters once and return a jitted `apply(x)` for the Pallas forward.

    weights[i]: [in_i, out_i] (already transposed vs. PyTorch), biases[i]: [out_i].
    """
    n_layers = len(weights)
    assert n_layers >= 1 and len(biases) == n_layers
    in_dim = weights[0].shape[0]
    out_dim = weights[-1].shape[1]
    compute_dtype = jnp.dtype(compute_dtype if compute_dtype is not None
                              else weights[0].dtype)
    itemsize = compute_dtype.itemsize

    # Lane-dense padding of every feature dim to a multiple of 128.  Padding is zero,
    # so ReLU(0*W + 0) = 0 keeps padded columns exactly zero through every layer.
    dims = [in_dim] + [w.shape[1] for w in weights]
    dims_p = [_round_up(d, _LANE) for d in dims]
    max_out_p = max(dims_p[1:])

    # ---- one-time parameter padding (device arrays, done at model build) ------------
    w_p_list, b_rows = [], []
    for li, (w, b) in enumerate(zip(weights, biases)):
        di, do = dims_p[li], dims_p[li + 1]
        w_p = jnp.zeros((di, do), compute_dtype)
        w_p = w_p.at[: w.shape[0], : w.shape[1]].set(jnp.asarray(w, compute_dtype))
        w_p_list.append(w_p)
        b_row = jnp.zeros((max_out_p,), compute_dtype)
        b_rows.append(b_row.at[: b.shape[0]].set(jnp.asarray(b, compute_dtype)))
    b_stack = jnp.stack(b_rows, axis=0)               # [n_layers, max_out_p]
    params = tuple(w_p_list) + (b_stack,)

    min_rows = _min_rows(compute_dtype)
    buffered_ok = _single_buffer_supported()
    vmem_budget = int(0.80 * _vmem_capacity_bytes())   # per-TensorCore

    param_bufs = 1 if buffered_ok else 2
    param_bytes = (sum(int(w.size) for w in w_p_list) + int(b_stack.size)) * itemsize
    param_bytes *= param_bufs

    def fused_vmem_need(tm):
        io = 2 * tm * (dims_p[0] + dims_p[-1]) * itemsize   # x/out double-buffered
        act = 4 * tm * max(dims_p) * 4                      # f32 intermediates headroom
        return param_bytes + io + act

    def choose_tile_m(B):
        if tile_m is not None:
            t = min(int(tile_m), _round_up(B, min_rows))
            return max(min_rows, _round_up(t, min_rows))
        if B <= 128:
            return _round_up(B, min_rows)   # tiny batches: one pipeline step
        if B <= 512:
            return 128                       # >= 2 grid steps (megacore-friendly)
        return 256                            # fill 256-wide MXU rows on v6e/v7x

    def fused_forward(x_p, w_list, b_all, tm):
        B_p = x_p.shape[0]
        grid = (B_p // tm,)
        in_specs = [pl.BlockSpec((tm, dims_p[0]), lambda i: (i, 0))]
        for arr in list(w_list) + [b_all]:
            if buffered_ok:
                # Grid-invariant parameters: single buffer (no double-buffer waste).
                in_specs.append(pl.BlockSpec(arr.shape, lambda i: (0, 0),
                                             pipeline_mode=pl.Buffered(1)))
            else:
                in_specs.append(pl.BlockSpec(arr.shape, lambda i: (0, 0)))
        out_specs = pl.BlockSpec((tm, dims_p[-1]), lambda i: (i, 0))
        need = fused_vmem_need(tm)
        vmem_limit = min(vmem_budget, max(int(1.25 * need), 4 << 20))
        kernel = functools.partial(_fused_mlp_kernel, n_layers)
        return pl.pallas_call(
            kernel,
            out_shape=jax.ShapeDtypeStruct((B_p, dims_p[-1]), compute_dtype),
            grid_spec=pltpu.PrefetchScalarGridSpec(
                num_scalar_prefetch=0,
                grid=grid,
                in_specs=in_specs,
                out_specs=out_specs,
            ),
            compiler_params=pltpu.CompilerParams(
                dimension_semantics=("parallel",),
                vmem_limit_bytes=vmem_limit,
            ),
        )(x_p, *w_list, b_all)

    def tiled_forward(x_p, w_list, b_all, tm):
        # Per-layer M/N/K-tiled matmul+bias+ReLU: used when the whole network's weights
        # cannot stay resident in per-core VMEM (large hid_dim, v7x 64 MiB).
        h = x_p
        for li, w_p in enumerate(w_list):
            K, N = w_p.shape
            b_p = b_all[li:li + 1, :N]
            h = _linear_relu_tiled(h, w_p, b_p,
                                   tile_m=tm,
                                   tile_n=_pick_tile(N, 512),
                                   tile_k=_pick_tile(K, 512),
                                   vmem_budget=vmem_budget)
        return h

    def forward(x, params):
        *w_list, b_all = params
        B = x.shape[0]
        tm = choose_tile_m(B)

        use_fused = not force_tiled
        if use_fused and fused_vmem_need(tm) > vmem_budget:
            while tm > min_rows and fused_vmem_need(tm) > vmem_budget:
                tm = max(min_rows, tm // 2)
            use_fused = fused_vmem_need(tm) <= vmem_budget

        B_p = _round_up(B, tm)
        x_p = jnp.zeros((B_p, dims_p[0]), compute_dtype)
        x_p = x_p.at[:B, :in_dim].set(x.astype(compute_dtype))

        if use_fused:
            out_p = fused_forward(x_p, w_list, b_all, tm)
        else:
            out_p = tiled_forward(x_p, w_list, b_all, tm)
        return out_p[:B, :out_dim].astype(x.dtype)

    forward_jit = jax.jit(forward)

    def apply(x):
        return forward_jit(x, params)

    return apply


# --------------------------- reference / init ------------------------------------------

def _init_params(key, in_dim, hid_dim, n_layers):
    """torch.nn.Linear-style init (uniform +/- 1/sqrt(fan_in)); weights stored [in, out]."""
    weights, biases = [], []
    dims = [in_dim] + [hid_dim] * n_layers
    for li in range(n_layers):
        fan_in, fan_out = dims[li], dims[li + 1]
        key, kw, kb = jax.random.split(key, 3)
        bound = 1.0 / jnp.sqrt(jnp.float32(fan_in))
        weights.append(jax.random.uniform(kw, (fan_in, fan_out), jnp.float32,
                                          -bound, bound))
        biases.append(jax.random.uniform(kb, (fan_out,), jnp.float32, -bound, bound))
    return weights, biases


def _reference(x, weights, biases):
    h = x
    for w, b in zip(weights, biases):
        h = jnp.maximum(h @ w + b, 0.0)
    return h


if __name__ == "__main__":
    # Small shapes consistent with the module: batch=16, in_dim=16, hid_dim=32, n_layers=3.
    key = jax.random.PRNGKey(0)
    key, kx = jax.random.split(key)
    B, in_dim, hid_dim, n_layers = 16, 16, 32, 3

    x = jax.random.normal(kx, (B, in_dim), jnp.float32)
    weights, biases = _init_params(key, in_dim, hid_dim, n_layers)
    ref = _reference(x, weights, biases)

    # 1) Default path: fused kernel, weights resident (single-buffered), f32 compute.
    model = make_forecasting_model(weights, biases)
    out = jax.block_until_ready(model(x))
    assert out.shape == (B, hid_dim), f"bad shape {out.shape}"
    assert jnp.allclose(out, ref, atol=1e-5, rtol=1e-5), "fused f32 mismatch"

    # 2) K/N-tiled per-layer path (auto-selected for weights that exceed VMEM budget).
    model_tiled = make_forecasting_model(weights, biases, force_tiled=True)
    out_t = jax.block_until_ready(model_tiled(x))
    assert jnp.allclose(out_t, ref, atol=1e-5, rtol=1e-5), "tiled path mismatch"

    # 3) bf16 weight/activation path (f32 MXU accumulation; looser tolerance).
    model_bf16 = make_forecasting_model(weights, biases, compute_dtype=jnp.bfloat16)
    out_b = jax.block_until_ready(model_bf16(x))
    assert out_b.dtype == x.dtype
    assert jnp.allclose(out_b, ref, atol=5e-2, rtol=5e-2), "bf16 path mismatch"

    print("KERNEL_OK")
</pallas_src>

<mosaic_0001>
module attributes {stable_mosaic.version = 11 : i64} {
  func.func @k(%arg0: i32, %arg1: memref<8x128xf32, #tpu.memory_space<vmem>>, %arg2: memref<8x128xf32, #tpu.memory_space<vmem>>, %arg3: memref<8x128xf32, #tpu.memory_space<vmem>>) attributes {dimension_semantics = [#tpu.dimension_semantics<arbitrary>], iteration_bounds = array<i64: 1>, scalar_prefetch = 0 : i64, scratch_operands = 0 : i64, tpu.core_type = #tpu.core_type<tc>, window_params = [{pipeline_mode = #tpu.pipeline_mode<synchronous>, transform_indices = @transform_0, window_bounds = array<i64: 8, 128>}, {pipeline_mode = #tpu.pipeline_mode<synchronous>, transform_indices = @transform_1, window_bounds = array<i64: 8, 128>}, {pipeline_mode = #tpu.pipeline_mode<synchronous>, transform_indices = @transform_2, window_bounds = array<i64: 8, 128>}]} {
    %c0 = arith.constant 0 : index
    %c0_0 = arith.constant 0 : index
    %0 = vector.load %arg1[%c0, %c0_0] : memref<8x128xf32, #tpu.memory_space<vmem>>, vector<8x128xf32>
    %c0_1 = arith.constant 0 : index
    %c0_2 = arith.constant 0 : index
    %1 = vector.load %arg2[%c0_1, %c0_2] : memref<8x128xf32, #tpu.memory_space<vmem>>, vector<8x128xf32>
    %2 = arith.addf %0, %1 : vector<8x128xf32>
    %c0_3 = arith.constant 0 : index
    %c0_4 = arith.constant 0 : index
    %3 = vector.load %arg3[%c0_3, %c0_4] : memref<8x128xf32, #tpu.memory_space<vmem>>, vector<8x128xf32>
    tpu.vector_store %arg3[%c0_3, %c0_4], %2 {strides = array<i32>} : memref<8x128xf32, #tpu.memory_space<vmem>>, vector<8x128xf32>,
    return
  }
  func.func @transform_0(%arg0: i32) -> (i32, i32) {
    %c0_i32 = arith.constant 0 : i32
    %c0_i32_0 = arith.constant 0 : i32
    %c0_i32_1 = arith.constant 0 : i32
    return %c0_i32, %c0_i32_0 : i32, i32
  }
  func.func @transform_1(%arg0: i32) -> (i32, i32) {
    %c0_i32 = arith.constant 0 : i32
    %c0_i32_0 = arith.constant 0 : i32
    %c0_i32_1 = arith.constant 0 : i32
    return %c0_i32, %c0_i32_0 : i32, i32
  }
  func.func @transform_2(%arg0: i32) -> (i32, i32) {
    %c0_i32 = arith.constant 0 : i32
    %c0_i32_0 = arith.constant 0 : i32
    %c0_i32_1 = arith.constant 0 : i32
    return %c0_i32, %c0_i32_0 : i32, i32
  }
}

module attributes {stable_mosaic.version = 11 : i64} {
  func.func @_fused_mlp_kernel(%arg0: i32, %arg1: memref<16x128xf32, #tpu.memory_space<vmem>>, %arg2: memref<128x128xf32, #tpu.memory_space<vmem>>, %arg3: memref<128x128xf32, #tpu.memory_space<vmem>>, %arg4: memref<128x128xf32, #tpu.memory_space<vmem>>, %arg5: memref<3x128xf32, #tpu.memory_space<vmem>>, %arg6: memref<16x128xf32, #tpu.memory_space<vmem>>) attributes {dimension_semantics = [#tpu.dimension_semantics<parallel>], iteration_bounds = array<i64: 1>, scalar_prefetch = 0 : i64, scratch_operands = 0 : i64, tpu.core_type = #tpu.core_type<tc>, window_params = [{transform_indices = @transform_0, window_bounds = array<i64: 16, 128>}, {pipeline_mode = #tpu.pipeline_mode<synchronous>, transform_indices = @transform_1, window_bounds = array<i64: 128, 128>}, {pipeline_mode = #tpu.pipeline_mode<synchronous>, transform_indices = @transform_2, window_bounds = array<i64: 128, 128>}, {pipeline_mode = #tpu.pipeline_mode<synchronous>, transform_indices = @transform_3, window_bounds = array<i64: 128, 128>}, {pipeline_mode = #tpu.pipeline_mode<synchronous>, transform_indices = @transform_4, window_bounds = array<i64: 3, 128>}, {transform_indices = @transform_5, window_bounds = array<i64: 16, 128>}]} {
    %c0 = arith.constant 0 : index
    %c0_0 = arith.constant 0 : index
    %0 = vector.load %arg1[%c0, %c0_0] : memref<16x128xf32, #tpu.memory_space<vmem>>, vector<16x128xf32>
    %c0_1 = arith.constant 0 : index
    %c0_2 = arith.constant 0 : index
    %1 = vector.load %arg2[%c0_1, %c0_2] : memref<128x128xf32, #tpu.memory_space<vmem>>, vector<128x128xf32>
    %c0_3 = arith.constant 0 : index
    %c0_4 = arith.constant 0 : index
    %2 = vector.load %arg5[%c0_3, %c0_4] : memref<3x128xf32, #tpu.memory_space<vmem>>, vector<1x128xf32>
    %cst = arith.constant dense<0.000000e+00> : vector<16x128xf32>
    %3 = tpu.matmul %0, %1, %cst {dimension_numbers = #tpu.dot_dimension_numbers<[1], [0], [0], [1], [0, 0, 1, 1], [], []>} : vector<16x128xf32>, vector<128x128xf32>, vector<16x128xf32> -> vector<16x128xf32>
    %4 = vector.broadcast %2 : vector<1x128xf32> to vector<16x128xf32>
    %5 = arith.addf %3, %4 : vector<16x128xf32>
    %cst_5 = arith.constant 0.000000e+00 : f32
    %6 = vector.broadcast %cst_5 : f32 to vector<16x128xf32>
    %7 = arith.maximumf %5, %6 : vector<16x128xf32>
    %c0_6 = arith.constant 0 : index
    %c0_7 = arith.constant 0 : index
    %8 = vector.load %arg3[%c0_6, %c0_7] : memref<128x128xf32, #tpu.memory_space<vmem>>, vector<128x128xf32>
    %c1 = arith.constant 1 : index
    %c0_8 = arith.constant 0 : index
    %9 = vector.load %arg5[%c1, %c0_8] : memref<3x128xf32, #tpu.memory_space<vmem>>, vector<1x128xf32>
    %cst_9 = arith.constant dense<0.000000e+00> : vector<16x128xf32>
    %10 = tpu.matmul %7, %8, %cst_9 {dimension_numbers = #tpu.dot_dimension_numbers<[1], [0], [0], [1], [0, 0, 1, 1], [], []>} : vector<16x128xf32>, vector<128x128xf32>, vector<16x128xf32> -> vector<16x128xf32>
    %11 = vector.broadcast %9 : vector<1x128xf32> to vector<16x128xf32>
    %12 = arith.addf %10, %11 : vector<16x128xf32>
    %cst_10 = arith.constant 0.000000e+00 : f32
    %13 = vector.broadcast %cst_10 : f32 to vector<16x128xf32>
    %14 = arith.maximumf %12, %13 : vector<16x128xf32>
    %c0_11 = arith.constant 0 : index
    %c0_12 = arith.constant 0 : index
    %15 = vector.load %arg4[%c0_11, %c0_12] : memref<128x128xf32, #tpu.memory_space<vmem>>, vector<128x128xf32>
    %c2 = arith.constant 2 : index
    %c0_13 = arith.constant 0 : index
    %16 = vector.load %arg5[%c2, %c0_13] : memref<3x128xf32, #tpu.memory_space<vmem>>, vector<1x128xf32>
    %cst_14 = arith.constant dense<0.000000e+00> : vector<16x128xf32>
    %17 = tpu.matmul %14, %15, %cst_14 {dimension_numbers = #tpu.dot_dimension_numbers<[1], [0], [0], [1], [0, 0, 1, 1], [], []>} : vector<16x128xf32>, vector<128x128xf32>, vector<16x128xf32> -> vector<16x128xf32>
    %18 = vector.broadcast %16 : vector<1x128xf32> to vector<16x128xf32>
    %19 = arith.addf %17, %18 : vector<16x128xf32>
    %cst_15 = arith.constant 0.000000e+00 : f32
    %20 = vector.broadcast %cst_15 : f32 to vector<16x128xf32>
    %21 = arith.maximumf %19, %20 : vector<16x128xf32>
    %c0_16 = arith.constant 0 : index
    %c0_17 = arith.constant 0 : index
    %22 = vector.load %arg6[%c0_16, %c0_17] : memref<16x128xf32, #tpu.memory_space<vmem>>, vector<16x128xf32>
    tpu.vector_store %arg6[%c0_16, %c0_17], %21 {strides = array<i32>} : memref<16x128xf32, #tpu.memory_space<vmem>>, vector<16x128xf32>,
    return
  }
  func.func @transform_0(%arg0: i32) -> (i32, i32) {
    %c0_i32 = arith.constant 0 : i32
    %c0_i32_0 = arith.constant 0 : i32
    return %arg0, %c0_i32 : i32, i32
  }
  func.func @transform_1(%arg0: i32) -> (i32, i32) {
    %c0_i32 = arith.constant 0 : i32
    %c0_i32_0 = arith.constant 0 : i32
    %c0_i32_1 = arith.constant 0 : i32
    return %c0_i32, %c0_i32_0 : i32, i32
  }
  func.func @transform_2(%arg0: i32) -> (i32, i32) {
    %c0_i32 = arith.constant 0 : i32
    %c0_i32_0 = arith.constant 0 : i32
    %c0_i32_1 = arith.constant 0 : i32
    return %c0_i32, %c0_i32_0 : i32, i32
  }
  func.func @transform_3(%arg0: i32) -> (i32, i32) {
    %c0_i32 = arith.constant 0 : i32
    %c0_i32_0 = arith.constant 0 : i32
    %c0_i32_1 = arith.constant 0 : i32
    return %c0_i32, %c0_i32_0 : i32, i32
  }
  func.func @transform_4(%arg0: i32) -> (i32, i32) {
    %c0_i32 = arith.constant 0 : i32
    %c0_i32_0 = arith.constant 0 : i32
    %c0_i32_1 = arith.constant 0 : i32
    return %c0_i32, %c0_i32_0 : i32, i32
  }
  func.func @transform_5(%arg0: i32) -> (i32, i32) {
    %c0_i32 = arith.constant 0 : i32
    %c0_i32_0 = arith.constant 0 : i32
    return %arg0, %c0_i32 : i32, i32
  }
}

</mosaic_0001>

<bundles_post_ra>
// kernel: tpu_custom_call.1
= control target key start
LH: loop header
LB: loop body
LE: loop exit
PB: predicated region body
PF: predicated region fallthrough
CT: control target
= control target key end

     0   :  { %7 = vsyncpa [#allocation3], 0  ;;  %s152_s0 = inlined_call_operand.hbm [shape: f32[8,128], index: 0, kind: input, shape index: {}]   ;;  %s153_s1 = inlined_call_operand.hbm [shape: f32[8,128], index: 1, kind: input, shape index: {}]   ;;  %s154_s2 = inlined_call_operand.hbm [shape: f32[8,128], index: 2, kind: output, shape index: {}]  }
   0x1   :  { %8 = vsyncpa [#allocation6], 0 }
   0x2   :  { %9 = vsyncpa [#allocation4], 0  ;;  %s125_s9 = smov [#allocation2]   ;;  %s126_s11 = smov [#allocation5]  }
   0x3   :  { %s16_s10 = sshll.u32 %s125_s9, 4  ;;  %s26_s12 = sshll.u32 %s126_s11, 4  ;;  %s17_s10 = int_to_ptr.vmem [resolvable:$true] %s16_s10  ;;  %s27_s12 = int_to_ptr.vmem [resolvable:$true] %s26_s12 }
   0x4   :  { %s67_s13 = scalar_lea.vmem %s17_s10, 128  ;;  %p72_p1 = scmp.lt.s32.totalorder %s17_s10, %s17_s10 }
   0x5   :  { %p68_p0 = scmp.ne.s32.totalorder %s17_s10, %s67_s13  ;;  %p73_p2 = scmp.lt.s32.totalorder %s67_s13, %s67_s13 }
   0x7   :  { %p74_p3 = por %p73_p2, %p72_p1 }
   0x9   :  { %p75_p4 = pnand %p74_p3, %p68_p0 }
   0xb   :  { %78 = shalt.err (!%p75_p4)
}
   0xc   :  { %19 = dma.hbm_to_vmem [thread:$0]  %s152_s0, 128, %s17_s10, [#allocation3]  }
   0xd   :  { %s87_s16 = scalar_lea.vmem %s27_s12, 128  ;;  %p92_p6 = scmp.lt.s32.totalorder %s27_s12, %s27_s12 }
   0xe   :  { %p88_p5 = scmp.ne.s32.totalorder %s27_s12, %s87_s16  ;;  %p93_p7 = scmp.lt.s32.totalorder %s87_s16, %s87_s16 }
  0x10   :  { %p94_p8 = por %p93_p7, %p92_p6 }
  0x12   :  { %p95_p9 = pnand %p94_p8, %p88_p5 }
  0x14   :  { %98 = shalt.err (!%p95_p9)
}
  0x15   :  { %29 = dma.hbm_to_vmem [thread:$0]  %s153_s1, 128, %s27_s12, [#allocation6]  }
  0x16   :  { %119 = dma.done.wait [#allocation3], 128  }
  0x17   :  { %120 = vsyncadd [#allocation3], 4294967168 }
  0x18   :  { %121 = dma.done.wait [#allocation6], 128  }
  0x19   :  { %122 = vsyncadd [#allocation6], 4294967168  ;;  %s127_s19 = smov [#allocation7]   ;;  %v36_v0 = vld [vmem:[#allocation2] sm:$0xff]  ;;  %v37_v1 = vld [vmem:[#allocation5] sm:$0xff] }
  0x1a   :  { %s46_s20 = sshll.u32 %s127_s19, 4  ;;  %v38_v2 = vadd.f32 %v37_v1, %v36_v0  ;;  %s47_s20 = int_to_ptr.vmem [resolvable:$true] %s46_s20 }
  0x1b   :  { %s99_s0 = scalar_lea.vmem %s47_s20, 128  ;;  %p104_p11 = scmp.lt.s32.totalorder %s47_s20, %s47_s20 }
  0x1c   :  { %39 = vst [vmem:[#allocation7] sm:$0xff] %v38_v2  ;;  %p100_p10 = scmp.ne.s32.totalorder %s47_s20, %s99_s0  ;;  %p105_p12 = scmp.lt.s32.totalorder %s99_s0, %s99_s0 }
  0x1e   :  { %p106_p13 = por %p105_p12, %p104_p11 }
  0x20   :  { %p107_p0 = pnand %p106_p13, %p100_p10 }
  0x22   :  { %110 = shalt.err (!%p107_p0)
}
  0x23   :  { %49 = dma.vmem_to_hbm [thread:$0]  %s47_s20, 128, %s154_s2, [#allocation4]  }
  0x24   :  { %123 = dma.done.wait [#allocation4], 128  }
  0x25   :  { %124 = vsyncadd [#allocation4], 4294967168 }
  0x26   :  { %53 = vsyncpa [#allocation3], 1 }
  0x27   :  { %54 = vsyncpa [#allocation6], 1 }
  0x28   :  { %55 = vsyncpa [#allocation4], 1 }

// kernel: forward.1
= control target key start
LH: loop header
LB: loop body
LE: loop exit
PB: predicated region body
PF: predicated region fallthrough
CT: control target
= control target key end

     0   :  { %10 = vsyncpa [#allocation3], 0  ;;  %s707_s0 = inlined_call_operand.vmem [shape: f32[16,128], index: 0, kind: input, shape index: {}]   ;;  %s708_s1 = inlined_call_operand.hbm [shape: f32[128,128], index: 1, kind: input, shape index: {}]   ;;  %s709_s2 = inlined_call_operand.hbm [shape: f32[128,128], index: 2, kind: input, shape index: {}]   ;;  %s710_s3 = inlined_call_operand.hbm [shape: f32[128,128], index: 3, kind: input, shape index: {}]   ;;  %s711_s4 = inlined_call_operand.vmem [shape: f32[3,128], index: 4, kind: input, shape index: {}]   ;;  %s712_s5 = inlined_call_operand.hbm [shape: f32[16,128], index: 5, kind: output, shape index: {}]  }
   0x1   :  { %11 = vsyncpa [#allocation6], 0 }
   0x2   :  { %12 = vsyncpa [#allocation4], 0  ;;  %s632_s18 = smov [#allocation5]   ;;  %s633_s20 = smov [#allocation2]  }
   0x3   :  { %s32_s19 = sshll.u32 %s632_s18, 4  ;;  %s20_s21 = sshll.u32 %s633_s20, 4  ;;  %s33_s19 = int_to_ptr.vmem [resolvable:$true] %s32_s19  ;;  %s21_s21 = int_to_ptr.vmem [resolvable:$true] %s20_s21 }
   0x4   :  { %s554_s22 = scalar_lea.vmem %s33_s19, 2048  ;;  %p559_p1 = scmp.lt.s32.totalorder %s33_s19, %s33_s19 }
   0x5   :  { %p555_p0 = scmp.ne.s32.totalorder %s33_s19, %s554_s22  ;;  %p560_p2 = scmp.lt.s32.totalorder %s554_s22, %s554_s22 }
   0x7   :  { %p561_p3 = por %p560_p2, %p559_p1 }
   0x9   :  { %p562_p4 = pnand %p561_p3, %p555_p0 }
   0xb   :  { %565 = shalt.err (!%p562_p4)
}
   0xc   :  { %s634_s23 = smov 128   ;;  %s635_s24 = smov 8  }
   0xd   :  { %38 = dma.hbm_to_vmem [thread:$0]  %s709_s2, 2048, %s33_s19, [#allocation6], %s634_s23, %s634_s23, %s635_s24  }
   0xe   :  { %s574_s27 = scalar_lea.vmem %s21_s21, 2048  ;;  %p579_p6 = scmp.lt.s32.totalorder %s21_s21, %s21_s21 }
   0xf   :  { %p575_p5 = scmp.ne.s32.totalorder %s21_s21, %s574_s27  ;;  %p580_p7 = scmp.lt.s32.totalorder %s574_s27, %s574_s27 }
  0x11   :  { %p581_p8 = por %p580_p7, %p579_p6 }
  0x13   :  { %p582_p9 = pnand %p581_p8, %p575_p5 }
  0x15   :  { %585 = shalt.err (!%p582_p9)
}
  0x16   :  { %26 = dma.hbm_to_vmem [thread:$0]  %s708_s1, 2048, %s21_s21, [#allocation3], %s634_s23, %s634_s23, %s635_s24  }
  0x17   :  { %s636_s30 = smov [#allocation7]  }
  0x18   :  { %s44_s6 = sshll.u32 %s636_s30, 4  ;;  %s45_s6 = int_to_ptr.vmem [resolvable:$true] %s44_s6 }
  0x19   :  { %s594_s7 = scalar_lea.vmem %s45_s6, 2048  ;;  %p599_p11 = scmp.lt.s32.totalorder %s45_s6, %s45_s6 }
  0x1a   :  { %p595_p10 = scmp.ne.s32.totalorder %s45_s6, %s594_s7  ;;  %p600_p12 = scmp.lt.s32.totalorder %s594_s7, %s594_s7 }
  0x1c   :  { %p601_p13 = por %p600_p12, %p599_p11 }
  0x1e   :  { %p602_p0 = pnand %p601_p13, %p595_p10 }
  0x20   :  { %605 = shalt.err (!%p602_p0)
}
  0x21   :  { %50 = dma.hbm_to_vmem [thread:$0]  %s710_s3, 2048, %s45_s6, [#allocation6], %s634_s23, %s634_s23, %s635_s24  }
  0x22   :  { %626 = dma.done.wait [#allocation3], 2048  }
  0x23   :  { %627 = vsyncadd [#allocation3], 4294965248 }
  0x24   :  { %628 = dma.done.wait [#allocation6], 4096  }
  0x25   :  { %629 = vsyncadd [#allocation6], 4294963200  ;;  %v79_v0 = vld [vmem:[#allocation2 + $0x78] sm:$0xff]  ;;  %v78_v1 = vld [vmem:[#allocation2 + $0x70] sm:$0xff]  ;;  %s637_s16 = smov [#allocation8]  }
  0x26   :  { %435 = vmatprep.subr.mxu0 %v79_v0  ;;  %v77_v2 = vld [vmem:[#allocation2 + $0x68] sm:$0xff]  ;;  %v76_v3 = vld [vmem:[#allocation2 + $0x60] sm:$0xff]  ;;  %v75_v5 = vld [vmem:[#allocation2 + $0x58] sm:$0xff]  ;;  %s365_s17 = sshll.u32 %s637_s16, 4  ;;  %s366_s17 = int_to_ptr.vmem [resolvable:$true] %s365_s17 }
  0x27   :  { %436 = vmatpush3.msra.mxu0 %v79_v0  ;;  %v62_v4 = vld [vmem:[%s707_s0] sm:$0xff]  ;;  %v177_v6 = vld [vmem:[#allocation5 + $0x78] sm:$0xff]  ;;  %v176_v7 = vld [vmem:[#allocation5 + $0x70] sm:$0xff]  ;;  %s606_s18 = scalar_lea.vmem %s366_s17, 256  ;;  %p611_p2 = scmp.lt.s32.totalorder %s366_s17, %s366_s17 }
  0x28   :  { %437 = vmatprep.subr.mxu0 %v78_v1  ;;  %467 = vmatprep.mubr.f32.mxu0 %v62_v4  ;;  %v74_v8 = vld [vmem:[#allocation2 + $0x50] sm:$0xff]  ;;  %v175_v9 = vld [vmem:[#allocation5 + $0x68] sm:$0xff]  ;;  %v174_v11 = vld [vmem:[#allocation5 + $0x60] sm:$0xff]  ;;  %p607_p1 = scmp.ne.s32.totalorder %s366_s17, %s606_s18  ;;  %p612_p3 = scmp.lt.s32.totalorder %s606_s18, %s606_s18 }
  0x29   :  { %438 = vmatpush3.msra.mxu0 %v78_v1  ;;  %470 = vmatprep.subr.mxu1 %v177_v6  ;;  %v73_v10 = vld [vmem:[#allocation2 + $0x48] sm:$0xff]  ;;  %v72_v12 = vld [vmem:[#allocation2 + $0x40] sm:$0xff]  ;;  %v173_v13 = vld [vmem:[#allocation5 + $0x58] sm:$0xff] }
  0x2a   :  { %439 = vmatprep.subr.mxu0 %v77_v2  ;;  %471 = vmatpush3.msra.mxu1 %v177_v6  ;;  %v71_v14 = vld [vmem:[#allocation2 + $0x38] sm:$0xff]  ;;  %v172_v15 = vld [vmem:[#allocation5 + $0x50] sm:$0xff]  ;;  %v171_v17 = vld [vmem:[#allocation5 + $0x48] sm:$0xff]  ;;  %p613_p4 = por %p612_p3, %p611_p2 }
  0x2b   :  { %440 = vmatpush3.msra.mxu0 %v77_v2  ;;  %472 = vmatprep.subr.mxu1 %v176_v7  ;;  %v70_v16 = vld [vmem:[#allocation2 + $0x30] sm:$0xff]  ;;  %v69_v18 = vld [vmem:[#allocation2 + $0x28] sm:$0xff]  ;;  %v170_v19 = vld [vmem:[#allocation5 + $0x40] sm:$0xff] }
  0x2c   :  { %441 = vmatprep.subr.mxu0 %v76_v3  ;;  %473 = vmatpush3.msra.mxu1 %v176_v7  ;;  %v68_v20 = vld [vmem:[#allocation2 + $0x20] sm:$0xff]  ;;  %v169_v21 = vld [vmem:[#allocation5 + $0x38] sm:$0xff]  ;;  %v168_v23 = vld [vmem:[#allocation5 + $0x30] sm:$0xff]  ;;  %p614_p5 = pnand %p613_p4, %p607_p1 }
  0x2d   :  { %442 = vmatpush3.msra.mxu0 %v76_v3  ;;  %474 = vmatprep.subr.mxu1 %v175_v9  ;;  %v67_v22 = vld [vmem:[#allocation2 + $0x18] sm:$0xff]  ;;  %v66_v24 = vld [vmem:[#allocation2 + $0x10] sm:$0xff]  ;;  %v167_v25 = vld [vmem:[#allocation5 + $0x28] sm:$0xff] }
  0x2e   :  { %443 = vmatprep.subr.mxu0 %v75_v5  ;;  %475 = vmatpush3.msra.mxu1 %v175_v9  ;;  %v65_v26 = vld [vmem:[#allocation2 + $0x8] sm:$0xff]  ;;  %v166_v27 = vld [vmem:[#allocation5 + $0x20] sm:$0xff]  ;;  %v165_v30 = vld [vmem:[#allocation5 + $0x18] sm:$0xff] }
  0x2f   :  { %444 = vmatpush3.msra.mxu0 %v75_v5  ;;  %476 = vmatprep.subr.mxu1 %v174_v11  ;;  %v64_v28 = vld [vmem:[#allocation2] sm:$0xff]  ;;  %v63_v29 = vld [vmem:[%s707_s0 + $0x8] sm:$0xff]  ;;  %v164_v31 = vld [vmem:[#allocation5 + $0x10] sm:$0xff] }
  0x30   :  { %445 = vmatprep.subr.mxu0 %v74_v8  ;;  %477 = vmatpush3.msra.mxu1 %v174_v11  ;;  %v163_v32 = vld [vmem:[#allocation5 + $0x8] sm:$0xff]  ;;  %v162_v33 = vld [vmem:[#allocation5] sm:$0xff]  ;;  %v275_v34 = vld [vmem:[#allocation7 + $0x78] sm:$0xff] }
  0x31   :  { %446 = vmatpush3.msra.mxu0 %v74_v8  ;;  %478 = vmatprep.subr.mxu1 %v173_v13  ;;  %v274_v35 = vld [vmem:[#allocation7 + $0x70] sm:$0xff]  ;;  %v273_v36 = vld [vmem:[#allocation7 + $0x68] sm:$0xff]  ;;  %v272_v37 = vld [vmem:[#allocation7 + $0x60] sm:$0xff] }
  0x32   :  { %447 = vmatprep.subr.mxu0 %v73_v10  ;;  %479 = vmatpush3.msra.mxu1 %v173_v13  ;;  %v271_v38 = vld [vmem:[#allocation7 + $0x58] sm:$0xff]  ;;  %v270_v39 = vld [vmem:[#allocation7 + $0x50] sm:$0xff]  ;;  %v269_v40 = vld [vmem:[#allocation7 + $0x48] sm:$0xff] }
  0x33   :  { %448 = vmatpush3.msra.mxu0 %v73_v10  ;;  %480 = vmatprep.subr.mxu1 %v172_v15  ;;  %v268_v41 = vld [vmem:[#allocation7 + $0x40] sm:$0xff]  ;;  %v267_v42 = vld [vmem:[#allocation7 + $0x38] sm:$0xff]  ;;  %v266_v43 = vld [vmem:[#allocation7 + $0x30] sm:$0xff] }
  0x34   :  { %449 = vmatprep.subr.mxu0 %v72_v12  ;;  %481 = vmatpush3.msra.mxu1 %v172_v15  ;;  %v265_v44 = vld [vmem:[#allocation7 + $0x28] sm:$0xff]  ;;  %v264_v45 = vld [vmem:[#allocation7 + $0x20] sm:$0xff]  ;;  %v263_v53 = vld [vmem:[#allocation7 + $0x18] sm:$0xff] }
  0x35   :  { %450 = vmatpush3.msra.mxu0 %v72_v12  ;;  %482 = vmatprep.subr.mxu1 %v171_v17  ;;  %v378_v46 = vld [vmem:[%s711_s4] ss:$0 sm:$0xff]  ;;  %v262_v54 = vld [vmem:[#allocation7 + $0x10] sm:$0xff]  ;;  %v261_v55 = vld [vmem:[#allocation7 + $0x8] sm:$0xff] }
  0x36   :  { %451 = vmatprep.subr.mxu0 %v71_v14  ;;  %483 = vmatpush3.msra.mxu1 %v171_v17  ;;  %v260_v56 = vld [vmem:[#allocation7] sm:$0xff] }
  0x37   :  { %452 = vmatpush3.msra.mxu0 %v71_v14  ;;  %484 = vmatprep.subr.mxu1 %v170_v19  ;;  %v379_v57 = vld [vmem:[%s711_s4 + $0x1] ss:$0 sm:$0xff]  ;;  %v380_v0 = vld [vmem:[%s711_s4 + $0x2] ss:$0 sm:$0xff] }
  0x38   :  { %453 = vmatprep.subr.mxu0 %v70_v16  ;;  %485 = vmatpush3.msra.mxu1 %v170_v19 }
  0x39   :  { %454 = vmatpush3.msra.mxu0 %v70_v16  ;;  %486 = vmatprep.subr.mxu1 %v169_v21 }
  0x3a   :  { %455 = vmatprep.subr.mxu0 %v69_v18  ;;  %487 = vmatpush3.msra.mxu1 %v169_v21 }
  0x3b   :  { %456 = vmatpush3.msra.mxu0 %v69_v18  ;;  %488 = vmatprep.subr.mxu1 %v168_v23 }
  0x3c   :  { %457 = vmatprep.subr.mxu0 %v68_v20  ;;  %489 = vmatpush3.msra.mxu1 %v168_v23 }
  0x3d   :  { %458 = vmatpush3.msra.mxu0 %v68_v20  ;;  %490 = vmatprep.subr.mxu1 %v167_v25 }
  0x3e   :  { %459 = vmatprep.subr.mxu0 %v67_v22  ;;  %491 = vmatpush3.msra.mxu1 %v167_v25 }
  0x3f   :  { %460 = vmatpush3.msra.mxu0 %v67_v22  ;;  %492 = vmatprep.subr.mxu1 %v166_v27 }
  0x40   :  { %461 = vmatprep.subr.mxu0 %v66_v24  ;;  %493 = vmatpush3.msra.mxu1 %v166_v27 }
  0x41   :  { %462 = vmatpush3.msra.mxu0 %v66_v24  ;;  %494 = vmatprep.subr.mxu1 %v165_v30 }
  0x42   :  { %463 = vmatprep.subr.mxu0 %v65_v26  ;;  %495 = vmatpush3.msra.mxu1 %v165_v30 }
  0x43   :  { %464 = vmatpush3.msra.mxu0 %v65_v26  ;;  %496 = vmatprep.subr.mxu1 %v164_v31 }
  0x44   :  { %465 = vmatprep.subr.mxu0 %v64_v28  ;;  %497 = vmatpush3.msra.mxu1 %v164_v31 }
  0x45   :  { %466 = vmatpush3.msra.mxu0 %v64_v28  ;;  %498 = vmatprep.subr.mxu1 %v163_v32 }
  0x46   :  { %468 = vmatmul.mubr.f32.vlgmr.msra.gmra.mxu0 %v63_v29  ;;  %499 = vmatpush3.msra.mxu1 %v163_v32 }
  0x47   :  { %500 = vmatprep.subr.mxu1 %v162_v33  ;;  %505 = vmatprep.subr.mxu0 %v275_v34 }
  0x48   :  { %501 = vmatpush3.msra.mxu1 %v162_v33  ;;  %506 = vmatpush3.msra.mxu0 %v275_v34 }
  0x49   :  { %507 = vmatprep.subr.mxu0 %v274_v35 }
  0x4a   :  { %508 = vmatpush3.msra.mxu0 %v274_v35 }
  0x4b   :  { %509 = vmatprep.subr.mxu0 %v273_v36 }
  0x4c   :  { %510 = vmatpush3.msra.mxu0 %v273_v36 }
  0x4d   :  { %511 = vmatprep.subr.mxu0 %v272_v37 }
  0x4e   :  { %512 = vmatpush3.msra.mxu0 %v272_v37 }
  0x4f   :  { %513 = vmatprep.subr.mxu0 %v271_v38 }
  0x50   :  { %514 = vmatpush3.msra.mxu0 %v271_v38 }
  0x51   :  { %515 = vmatprep.subr.mxu0 %v270_v39 }
  0x52   :  { %516 = vmatpush3.msra.mxu0 %v270_v39 }
  0x53   :  { %517 = vmatprep.subr.mxu0 %v269_v40 }
  0x54   :  { %518 = vmatpush3.msra.mxu0 %v269_v40 }
  0x55   :  { %519 = vmatprep.subr.mxu0 %v268_v41 }
  0x56   :  { %520 = vmatpush3.msra.mxu0 %v268_v41 }
  0x57   :  { %521 = vmatprep.subr.mxu0 %v267_v42 }
  0x58   :  { %522 = vmatpush3.msra.mxu0 %v267_v42 }
  0x59   :  { %523 = vmatprep.subr.mxu0 %v266_v43 }
  0x5a   :  { %524 = vmatpush3.msra.mxu0 %v266_v43 }
  0x5b   :  { %525 = vmatprep.subr.mxu0 %v265_v44 }
  0x5c   :  { %526 = vmatpush3.msra.mxu0 %v265_v44 }
  0x5d   :  { %527 = vmatprep.subr.mxu0 %v264_v45 }
  0x5e   :  { %528 = vmatpush3.msra.mxu0 %v264_v45 }
  0x5f   :  { %529 = vmatprep.subr.mxu0 %v263_v53 }
  0x60   :  { %530 = vmatpush3.msra.mxu0 %v263_v53 }
  0x61   :  { %531 = vmatprep.subr.mxu0 %v262_v54 }
  0x62   :  { %532 = vmatpush3.msra.mxu0 %v262_v54 }
  0x63   :  { %533 = vmatprep.subr.mxu0 %v261_v55 }
  0x64   :  { %534 = vmatpush3.msra.mxu0 %v261_v55 }
  0x65   :  { %535 = vmatprep.subr.mxu0 %v260_v56 }
  0x66   :  { %536 = vmatpush3.msra.mxu0 %v260_v56 }
 0x106   :  { %v469_v47 = vpop.f32.mrf.mxu0 }
 0x107   :  { %v157_v48 = vadd.f32 %v469_v47, %v378_v46 }
 0x108   :  { %v151_v49 = vpop.f32.mrf.mxu0 }
 0x109   :  { %v152_v50 = vadd.f32 %v378_v46, %v151_v49  ;;  %v161_v52 = vmax.f32 %v157_v48, 0.0 }
 0x10b   :  { %v160_v51 = vmax.f32 %v152_v50, 0.0 }
 0x10d   :  { %502 = vmatprep.mubr.f32.mxu1 %v160_v51 }
 0x10e   :  { %503 = vmatmul.mubr.f32.vlgmr.msra.gmra.mxu1 %v161_v52 }
 0x1ce   :  { %v504_v58 = vpop.f32.mrf.mxu1 }
 0x1cf   :  { %v255_v59 = vadd.f32 %v504_v58, %v379_v57 }
 0x1d0   :  { %v249_v60 = vpop.f32.mrf.mxu1 }
 0x1d1   :  { %v250_v61 = vadd.f32 %v379_v57, %v249_v60  ;;  %v259_v63 = vmax.f32 %v255_v59, 0.0 }
 0x1d3   :  { %v258_v62 = vmax.f32 %v250_v61, 0.0 }
 0x1d5   :  { %537 = vmatprep.mubr.f32.mxu0 %v258_v62 }
 0x1d6   :  { %538 = vmatmul.mubr.f32.vlgmr.msra.gmra.mxu0 %v259_v63 }
 0x296   :  { %v539_v1 = vpop.f32.mrf.mxu0 }
 0x297   :  { %v353_v2 = vadd.f32 %v539_v1, %v380_v0 }
 0x298   :  { %v347_v3 = vpop.f32.mrf.mxu0 }
 0x299   :  { %v357_v4 = vmax.f32 %v353_v2, 0.0  ;;  %v348_v5 = vadd.f32 %v380_v0, %v347_v3 }
 0x29b   :  { %359 = vst [vmem:[#allocation8 + $0x8] sm:$0xff] %v357_v4  ;;  %v356_v6 = vmax.f32 %v348_v5, 0.0 }
 0x29d   :  { %358 = vst [vmem:[#allocation8] sm:$0xff] %v356_v6 }
 0x29e   :  { %617 = shalt.err (!%p614_p5)
}
 0x29f   :  { %371 = dma.vmem_to_hbm [thread:$0]  %s366_s17, 256, %s712_s5, [#allocation4], %s634_s23, %s634_s23, %s635_s24  }
 0x2a0   :  { %630 = dma.done.wait [#allocation4], 256  }
 0x2a1   :  { %631 = vsyncadd [#allocation4], 4294967040 }
 0x2a2   :  { %375 = vsyncpa [#allocation3], 1 }
 0x2a3   :  { %376 = vsyncpa [#allocation6], 1 }
 0x2a4   :  { %377 = vsyncpa [#allocation4], 1 }

</bundles_post_ra>
